<compile_context>
chip_gen: v7x
topology: tpu7x:2x2x1
jax: 0.10.0
libtpu: 0.0.40
codegen_flags: <defaults>
</compile_context>

<pallas_src>
import jax
import jax.numpy as jnp
import numpy as np
from jax.experimental import pallas as pl
from jax.experimental.pallas import tpu as pltpu


def _round_up(x, m):
    return (x + m - 1) // m * m


def sic_kernel(x_ref, w_ref, o_ref):
    # x_ref: (TM, H) rows of (gathered citing - gathered cited)
    # w_ref: (H, H) = W_2.weight.T  (so y = x @ w), resident across the grid
    y = jnp.dot(x_ref[...], w_ref[...], preferred_element_type=jnp.float32)
    o_ref[...] = jnp.tanh(y).astype(o_ref.dtype)


def sic_forward(citing_emb, cited_emb, citing_cs_idx, cited_cs_idx,
                W2_weight, W2_bias=None, *, row_tile=512):
    """citing_emb, cited_emb: (B, S, H); *_cs_idx: (K,) int32; returns (B, K, H).

    W2_bias is accepted for API parity with nn.Linear but cancels exactly in
    the subtraction, so it never reaches the kernel.
    """
    del W2_bias  # (x1 @ W.T + b) - (x2 @ W.T + b) == (x1 - x2) @ W.T
    B, S, H = citing_emb.shape
    K = citing_cs_idx.shape[0]

    # Gather along seq + subtract (fuses into one XLA op -> one (B,K,H) slab),
    # then flatten batch into the matmul M dimension.
    diff = (jnp.take(citing_emb, citing_cs_idx, axis=1)
            - jnp.take(cited_emb, cited_cs_idx, axis=1))          # (B, K, H)
    M = B * K
    x = diff.reshape(M, H)

    # Row tiling: large sublane-aligned tiles; pad rows so the grid divides.
    tm = min(row_tile, _round_up(M, 8))
    m_pad = _round_up(M, tm)
    if m_pad != M:
        x = jnp.pad(x, ((0, m_pad - M), (0, 0)))

    w_t = W2_weight.T                                             # (H, H): y = x @ w_t

    out_flat = pl.pallas_call(
        sic_kernel,
        out_shape=jax.ShapeDtypeStruct((m_pad, H), citing_emb.dtype),
        grid_spec=pltpu.PrefetchScalarGridSpec(
            num_scalar_prefetch=0,
            grid=(m_pad // tm,),
            in_specs=[
                pl.BlockSpec((tm, H), lambda m: (m, 0)),
                pl.BlockSpec((H, H), lambda m: (0, 0)),   # same block every step
            ],
            out_specs=pl.BlockSpec((tm, H), lambda m: (m, 0)),
        ),
        compiler_params=pltpu.CompilerParams(
            dimension_semantics=("parallel",)),
    )(x, w_t)

    return out_flat[:M].reshape(B, K, H)


def init_params(key, hidden_size):
    """Deterministic init mimicking nn.Linear shapes (uniform(-1/sqrt(H), 1/sqrt(H)))."""
    bound = 1.0 / np.sqrt(hidden_size)
    k1, k2, k3, k4 = jax.random.split(key, 4)
    # W_1 exists in the module's __init__ but is unused in forward; kept for parity.
    W1_weight = jax.random.uniform(k1, (hidden_size, hidden_size), jnp.float32, -bound, bound)
    W1_bias = jax.random.uniform(k2, (hidden_size,), jnp.float32, -bound, bound)
    W2_weight = jax.random.uniform(k3, (hidden_size, hidden_size), jnp.float32, -bound, bound)
    W2_bias = jax.random.uniform(k4, (hidden_size,), jnp.float32, -bound, bound)
    return W1_weight, W1_bias, W2_weight, W2_bias


if __name__ == "__main__":
    B, S, H, K = 2, 16, 32, 8

    key = jax.random.PRNGKey(0)
    kp, kc1, kc2, ki1, ki2 = jax.random.split(key, 5)

    _, _, W2_w, W2_b = init_params(kp, H)

    citing_emb = jax.random.normal(kc1, (B, S, H), jnp.float32)
    cited_emb = jax.random.normal(kc2, (B, S, H), jnp.float32)
    citing_cs_idx = jax.random.randint(ki1, (K,), 0, S, jnp.int32)
    cited_cs_idx = jax.random.randint(ki2, (K,), 0, S, jnp.int32)

    out = sic_forward(citing_emb, cited_emb, citing_cs_idx, cited_cs_idx, W2_w, W2_b)
    out = jax.block_until_ready(out)

    # Pure-JAX reference in the exact PyTorch op order (Linear -> index_select -> sub -> tanh).
    y_citing = citing_emb @ W2_w.T + W2_b
    y_cited = cited_emb @ W2_w.T + W2_b
    ref = jnp.tanh(jnp.take(y_citing, citing_cs_idx, axis=1)
                   - jnp.take(y_cited, cited_cs_idx, axis=1))
    assert out.shape == (B, K, H)
    np.testing.assert_allclose(np.asarray(out), np.asarray(ref), rtol=1e-5, atol=1e-5)

    print("KERNEL_OK")
</pallas_src>

<mosaic_0001>
module attributes {stable_mosaic.version = 11 : i64} {
  func.func @sic_kernel(%arg0: i32, %arg1: memref<16x32xf32, #tpu.memory_space<vmem>>, %arg2: memref<32x32xf32, #tpu.memory_space<vmem>>, %arg3: memref<16x32xf32, #tpu.memory_space<vmem>>) attributes {dimension_semantics = [#tpu.dimension_semantics<parallel>], iteration_bounds = array<i64: 1>, scalar_prefetch = 0 : i64, scratch_operands = 0 : i64, tpu.core_type = #tpu.core_type<tc>, window_params = [{transform_indices = @transform_0, window_bounds = array<i64: 16, 32>}, {pipeline_mode = #tpu.pipeline_mode<synchronous>, transform_indices = @transform_1, window_bounds = array<i64: 32, 32>}, {transform_indices = @transform_2, window_bounds = array<i64: 16, 32>}]} {
    %c0 = arith.constant 0 : index
    %c0_0 = arith.constant 0 : index
    %0 = vector.load %arg1[%c0, %c0_0] : memref<16x32xf32, #tpu.memory_space<vmem>>, vector<16x32xf32>
    %c0_1 = arith.constant 0 : index
    %c0_2 = arith.constant 0 : index
    %1 = vector.load %arg2[%c0_1, %c0_2] : memref<32x32xf32, #tpu.memory_space<vmem>>, vector<32x32xf32>
    %cst = arith.constant dense<0.000000e+00> : vector<16x32xf32>
    %2 = tpu.matmul %0, %1, %cst {dimension_numbers = #tpu.dot_dimension_numbers<[1], [0], [0], [1], [0, 0, 1, 1], [], []>} : vector<16x32xf32>, vector<32x32xf32>, vector<16x32xf32> -> vector<16x32xf32>
    %3 = math.tanh %2 : vector<16x32xf32>
    %c0_3 = arith.constant 0 : index
    %c0_4 = arith.constant 0 : index
    %4 = vector.load %arg3[%c0_3, %c0_4] : memref<16x32xf32, #tpu.memory_space<vmem>>, vector<16x32xf32>
    tpu.vector_store %arg3[%c0_3, %c0_4], %3 {strides = array<i32>} : memref<16x32xf32, #tpu.memory_space<vmem>>, vector<16x32xf32>,
    return
  }
  func.func @transform_0(%arg0: i32) -> (i32, i32) {
    %c0_i32 = arith.constant 0 : i32
    %c0_i32_0 = arith.constant 0 : i32
    return %arg0, %c0_i32 : i32, i32
  }
  func.func @transform_1(%arg0: i32) -> (i32, i32) {
    %c0_i32 = arith.constant 0 : i32
    %c0_i32_0 = arith.constant 0 : i32
    %c0_i32_1 = arith.constant 0 : i32
    return %c0_i32, %c0_i32_0 : i32, i32
  }
  func.func @transform_2(%arg0: i32) -> (i32, i32) {
    %c0_i32 = arith.constant 0 : i32
    %c0_i32_0 = arith.constant 0 : i32
    return %arg0, %c0_i32 : i32, i32
  }
}

</mosaic_0001>

<bundles_post_ra>
// kernel: tpu_custom_call.1
= control target key start
LH: loop header
LB: loop body
LE: loop exit
PB: predicated region body
PF: predicated region fallthrough
CT: control target
= control target key end

     0   :  { %7 = vsyncpa [#allocation3], 0  ;;  %s327_s0 = inlined_call_operand.hbm [shape: f32[16,32], index: 0, kind: input, shape index: {}]   ;;  %s328_s1 = inlined_call_operand.hbm [shape: f32[32,32], index: 1, kind: input, shape index: {}]   ;;  %s329_s2 = inlined_call_operand.hbm [shape: f32[16,32], index: 2, kind: output, shape index: {}]  }
   0x1   :  { %8 = vsyncpa [#allocation6], 0 }
   0x2   :  { %9 = vsyncpa [#allocation4], 0  ;;  %s258_s9 = smov [#allocation2]   ;;  %s186_s13 = scalar_lea.hbm %s327_s0, 256 }
   0x3   :  { %s15_s10 = sshll.u32 %s258_s9, 4  ;;  %p187_p0 = scmp.ne.s32.totalorder %s327_s0, %s186_s13  ;;  %s16_s10 = int_to_ptr.vmem [resolvable:$true] %s15_s10 }
   0x4   :  { %p190_p1 = scmp.lt.u32.totalorder %s186_s13, %s327_s0 }
   0x6   :  { %p192_p2 = pnand %p190_p1, %p187_p0 }
   0x8   :  { %195 = shalt.err (!%p192_p2)
}
   0x9   :  { %s196_s18 = scalar_lea.vmem %s16_s10, 256  ;;  %p201_p4 = scmp.lt.s32.totalorder %s16_s10, %s16_s10 }
   0xa   :  { %p197_p3 = scmp.ne.s32.totalorder %s16_s10, %s196_s18  ;;  %p202_p5 = scmp.lt.s32.totalorder %s196_s18, %s196_s18 }
   0xc   :  { %p203_p6 = por %p202_p5, %p201_p4 }
   0xe   :  { %p204_p7 = pnand %p203_p6, %p197_p3 }
  0x10   :  { %207 = shalt.err (!%p204_p7)
}
  0x11   :  { %s259_s19 = smov 128   ;;  %s260_s20 = smov 8  }
  0x12   :  { %21 = dma.hbm_to_vmem [thread:$0]  %s327_s0, 256, %s16_s10, [#allocation3], %s259_s19, %s259_s19, %s260_s20  }
  0x13   :  { %s261_s23 = smov [#allocation5]   ;;  %s208_s27 = scalar_lea.hbm %s328_s1, 512 }
  0x14   :  { %s27_s24 = sshll.u32 %s261_s23, 4  ;;  %p209_p8 = scmp.ne.s32.totalorder %s328_s1, %s208_s27  ;;  %s28_s24 = int_to_ptr.vmem [resolvable:$true] %s27_s24 }
  0x15   :  { %p212_p9 = scmp.lt.u32.totalorder %s208_s27, %s328_s1 }
  0x17   :  { %p214_p10 = pnand %p212_p9, %p209_p8 }
  0x19   :  { %217 = shalt.err (!%p214_p10)
}
  0x1a   :  { %s218_s4 = scalar_lea.vmem %s28_s24, 512  ;;  %p223_p12 = scmp.lt.s32.totalorder %s28_s24, %s28_s24 }
  0x1b   :  { %p219_p11 = scmp.ne.s32.totalorder %s28_s24, %s218_s4  ;;  %p224_p13 = scmp.lt.s32.totalorder %s218_s4, %s218_s4 }
  0x1d   :  { %p225_p0 = por %p224_p13, %p223_p12 }
  0x1f   :  { %p226_p1 = pnand %p225_p0, %p219_p11 }
  0x21   :  { %229 = shalt.err (!%p226_p1)
}
  0x22   :  { %33 = dma.hbm_to_vmem [thread:$0]  %s328_s1, 512, %s28_s24, [#allocation6], %s259_s19, %s259_s19, %s260_s20  }
  0x23   :  { %252 = dma.done.wait [#allocation3], 256  }
  0x24   :  { %253 = vsyncadd [#allocation3], 4294967040 }
  0x25   :  { %254 = dma.done.wait [#allocation6], 512  }
  0x26   :  { %255 = vsyncadd [#allocation6], 4294966784  ;;  %vm46_vm0 = vcmask 261120   ;;  %v42_v0 = vld [vmem:[#allocation5] sm:$0xff]  ;;  %v43_v1 = vld [vmem:[#allocation5 + $0x8] sm:$0xff]  ;;  %s262_s1 = smov [#allocation7]  }
  0x27   :  { %v44_v2 = vld [vmem:[#allocation5 + $0x10] sm:$0xff]  ;;  %v169_v3 = vpack.c.bf16 %v43_v1, %v42_v0  ;;  %v45_v4 = vld [vmem:[#allocation5 + $0x18] sm:$0xff]  ;;  %s137_s6 = sshll.u32 %s262_s1, 4  ;;  %s138_s6 = int_to_ptr.vmem [resolvable:$true] %s137_s6 }
  0x28   :  { %v40_v5 = vld [vmem:[#allocation2] sm:$0xff]  ;;  %v173_v6 = vpack.c.bf16 %v45_v4, %v44_v2  ;;  %v41_v7 = vld [vmem:[#allocation2 + $0x8] sm:$0xff]  ;;  %s230_s7 = scalar_lea.vmem %s138_s6, 256  ;;  %p235_p3 = scmp.lt.s32.totalorder %s138_s6, %s138_s6 }
  0x29   :  { %166 = vmatprep.mubr.msk.f32.mxu0 %vm46_vm0, %v40_v5  ;;  %170 = vmatprep.subr.bf16.mxu0 %v169_v3  ;;  %p231_p2 = scmp.ne.s32.totalorder %s138_s6, %s230_s7  ;;  %p236_p4 = scmp.lt.s32.totalorder %s230_s7, %s230_s7 }
  0x2a   :  { %172 = vmatpush3.bf16.msra.mxu0 %v169_v3 }
  0x2b   :  { %174 = vmatprep.subr.bf16.mxu0 %v173_v6  ;;  %p237_p5 = por %p236_p4, %p235_p3 }
  0x2d   :  { %p238_p6 = pnand %p237_p5, %p231_p2 }
  0x2e   :  { %176 = vmatpush3.bf16.msra.mxu0 %v173_v6 }
  0x31   :  { %167 = vmatmul.mubr.msk.f32.vlgmr.msra.gmra.mrb[0].mxu0 %vm46_vm0, %v41_v7 }
 0x104   :  { %v168_v8 = vpop.f32.mrb[0].mxu0 }
 0x105   :  { %182 = vtanh.f32 %v168_v8  ;;  %v119_v9 = vpop.f32.mrb[1].mxu0 }
 0x106   :  { %184 = vtanh.f32 %v119_v9 }
 0x10f   :  { %v183_v10 = vpop.eup %182 }
 0x110   :  { %v185_v11 = vpop.eup %184  ;;  %131 = vst.msk [vmem:[#allocation7 + $0x8] sm:$0xff] %vm46_vm0, %v183_v10 }
 0x111   :  { %130 = vst.msk [vmem:[#allocation7] sm:$0xff] %vm46_vm0, %v185_v11 }
 0x112   :  { %241 = shalt.err (!%p238_p6)
}
 0x113   :  { %s242_s10 = scalar_lea.hbm %s329_s2, 256 }
 0x114   :  { %p243_p7 = scmp.ne.s32.totalorder %s329_s2, %s242_s10  ;;  %p246_p8 = scmp.lt.u32.totalorder %s242_s10, %s329_s2 }
 0x116   :  { %p248_p9 = pnand %p246_p8, %p243_p7 }
 0x118   :  { %251 = shalt.err (!%p248_p9)
}
 0x119   :  { %143 = dma.vmem_to_hbm [thread:$0]  %s138_s6, 256, %s329_s2, [#allocation4], %s259_s19, %s259_s19, %s260_s20  }
 0x11a   :  { %256 = dma.done.wait [#allocation4], 256  }
 0x11b   :  { %257 = vsyncadd [#allocation4], 4294967040 }
 0x11c   :  { %147 = vsyncpa [#allocation3], 1 }
 0x11d   :  { %148 = vsyncpa [#allocation6], 1 }
 0x11e   :  { %149 = vsyncpa [#allocation4], 1 }

</bundles_post_ra>
